<compile_context>
chip_gen: v5e
topology: v5e:2x2
jax: 0.10.0
libtpu: 0.0.40
codegen_flags: <defaults>
</compile_context>

<pallas_src>
import jax
import jax.numpy as jnp
from jax.experimental import pallas as pl
from jax.experimental.pallas import tpu as pltpu

LANES = 128              # lane width of the packed parameter slab
_TB_MAX = 2048           # max batch-tile rows (sweep 1024 / 2048 / 4096)
_SINGLE_BLOCK_MAX = 256  # up to this batch, use one gridless block


def _round8(n):
    return ((n + 7) // 8) * 8


def _slab_layout(state_dim, action_dim, h1, h2, out_dim):
    """8-row-aligned row offsets of each parameter in the (rows, 128) slab."""
    w1s = 0                                 # W1 rows for `state`   (lanes 0:h1)
    w1a = w1s + _round8(state_dim)          # W1 rows for `action`  (lanes 0:h1)
    w2 = w1a + _round8(action_dim)          # W2, K padded to LANES (lanes 0:h2)
    w3t = w2 + LANES                        # W3^T, out_dim rows    (lanes 0:h2)
    b1 = w3t + _round8(out_dim)             # bias1 row             (lanes 0:h1)
    b2 = b1 + 8                             # bias2 row             (lanes 0:h2)
    b3 = b2 + 8                             # bias3 row             (lanes 0:out)
    rows = b3 + 8
    return {"w1s": w1s, "w1a": w1a, "w2": w2, "w3t": w3t,
            "b1": b1, "b2": b2, "b3": b3, "rows": rows}


def pack_params(params, state_dim, action_dim):
    """Pack the six parameter tensors into one lane-dense f32 slab (one DMA)."""
    w1, b1, w2, b2, w3, b3 = params
    in_dim, h1 = w1.shape
    _, h2 = w2.shape
    out_dim = w3.shape[1]
    assert in_dim == state_dim + action_dim
    assert h1 <= LANES and h2 <= LANES and out_dim <= LANES

    L = _slab_layout(state_dim, action_dim, h1, h2, out_dim)
    slab = jnp.zeros((L["rows"], LANES), jnp.float32)
    slab = slab.at[L["w1s"]:L["w1s"] + state_dim, 0:h1].set(
        w1[:state_dim].astype(jnp.float32))
    slab = slab.at[L["w1a"]:L["w1a"] + action_dim, 0:h1].set(
        w1[state_dim:].astype(jnp.float32))
    slab = slab.at[L["w2"]:L["w2"] + h1, 0:h2].set(w2.astype(jnp.float32))
    slab = slab.at[L["w3t"]:L["w3t"] + out_dim, 0:h2].set(
        w3.astype(jnp.float32).T)
    slab = slab.at[L["b1"], 0:h1].set(b1.reshape(-1).astype(jnp.float32))
    slab = slab.at[L["b2"], 0:h2].set(b2.reshape(-1).astype(jnp.float32))
    slab = slab.at[L["b3"], 0:out_dim].set(b3.reshape(-1).astype(jnp.float32))
    return slab


def _make_kernel(state_dim, action_dim, h1, h2, out_dim, L):
    w1s_r, w1a_r, w2_r, w3t_r = L["w1s"], L["w1a"], L["w2"], L["w3t"]
    b1_r, b2_r, b3_r = L["b1"], L["b2"], L["b3"]

    def kernel(state_ref, action_ref, slab_ref, o_ref):
        state = state_ref[...]                          # (tb, S)
        action = action_ref[...]                        # (tb, A)

        # Layer 1: concat fused as split matmul. Weight rows are 8-aligned and
        # full 128-lane width (zeros past h1), so x carries 128 lanes with
        # zeros in lanes >= h1.
        w1s = slab_ref[w1s_r:w1s_r + state_dim, :]      # (S, 128)
        w1a = slab_ref[w1a_r:w1a_r + action_dim, :]     # (A, 128)
        b1 = slab_ref[b1_r:b1_r + 1, :]                 # (1, 128)
        x = (jnp.dot(state, w1s, preferred_element_type=jnp.float32)
             + jnp.dot(action, w1a, preferred_element_type=jnp.float32)
             + b1)
        x = jnp.maximum(x, 0.0)

        # Layer 2: W2 zero-padded to (128, 128); lanes >= h2 stay zero.
        w2 = slab_ref[w2_r:w2_r + LANES, :]             # (128, 128)
        b2 = slab_ref[b2_r:b2_r + 1, :]                 # (1, 128)
        x = jnp.dot(x, w2, preferred_element_type=jnp.float32) + b2
        x = jnp.maximum(x, 0.0)

        # Layer 3: narrow output — no 128-lane padded HBM writeback.
        w3t = slab_ref[w3t_r:w3t_r + out_dim, :]        # (out, 128), lanes>=h2 zero
        b3 = slab_ref[b3_r:b3_r + 1, 0:out_dim]         # (1, out)
        if out_dim == 1:
            # VPU multiply + XLU lane-reduce; avoids an MXU N=1 matmul.
            out = jnp.sum(x * w3t, axis=-1, keepdims=True) + b3
        else:
            out = jax.lax.dot_general(
                x, w3t, (((1,), (1,)), ((), ())),
                preferred_element_type=jnp.float32) + b3
        o_ref[...] = out.astype(o_ref.dtype)

    return kernel


def critic_forward(state, action, slab, *, hidden_size, output_size):
    """CriticNetwork forward: single fused Pallas kernel."""
    batch, state_dim = state.shape
    action_dim = action.shape[1]
    h1, h2 = hidden_size
    L = _slab_layout(state_dim, action_dim, h1, h2, output_size)
    assert slab.shape == (L["rows"], LANES)

    if batch <= _SINGLE_BLOCK_MAX:
        # Single gridless block: block dims == full array dims, no padding.
        tb = batch
    else:
        # Multiple-of-8 tile, capped so the "parallel" grid has >= 2 blocks
        # (both v7x TensorCores get work). No host-side pad: Pallas masks the
        # ragged last block's writeback; rows are independent so the garbage
        # rows fed into the dots for the partial block are harmless.
        tb = min(_TB_MAX, _round8(pl.cdiv(batch, 2)))
    grid = (pl.cdiv(batch, tb),)

    kernel = _make_kernel(state_dim, action_dim, h1, h2, output_size, L)
    return pl.pallas_call(
        kernel,
        out_shape=jax.ShapeDtypeStruct((batch, output_size), jnp.float32),
        grid=grid,
        in_specs=[
            pl.BlockSpec((tb, state_dim), lambda i: (i, 0)),
            pl.BlockSpec((tb, action_dim), lambda i: (i, 0)),
            pl.BlockSpec((L["rows"], LANES), lambda i: (0, 0)),  # replicated params
        ],
        out_specs=pl.BlockSpec((tb, output_size), lambda i: (i, 0)),
        compiler_params=pltpu.CompilerParams(
            dimension_semantics=("parallel",)),
    )(state, action, slab)


def init_params(key, input_size, hidden_size, output_size):
    """Deterministic parameter init (PyTorch Linear-style uniform fan-in)."""
    sizes = [input_size, hidden_size[0], hidden_size[1], output_size]
    params = []
    for i in range(3):
        fan_in, fan_out = sizes[i], sizes[i + 1]
        key, kw, kb = jax.random.split(key, 3)
        bound = 1.0 / jnp.sqrt(jnp.float32(fan_in))
        # stored as (in, out) == PyTorch weight.T
        w = jax.random.uniform(kw, (fan_in, fan_out), jnp.float32, -bound, bound)
        b = jax.random.uniform(kb, (1, fan_out), jnp.float32, -bound, bound)
        params += [w, b]
    return tuple(params)


def critic_reference(state, action, params):
    """Pure-JAX reference for sanity checking."""
    w1, b1, w2, b2, w3, b3 = params
    x = jnp.concatenate([state, action], axis=1)
    x = jnp.maximum(x @ w1 + b1, 0.0)
    x = jnp.maximum(x @ w2 + b2, 0.0)
    return x @ w3 + b3


if __name__ == "__main__":
    hidden_size = [32, 64]
    batch = 2
    state_dim = 6
    action_dim = 2
    input_size = state_dim + action_dim
    output_size = 1

    key = jax.random.PRNGKey(0)
    kp, ks, ka = jax.random.split(key, 3)

    params = init_params(kp, input_size, hidden_size, output_size)
    slab = pack_params(params, state_dim, action_dim)
    state = jax.random.normal(ks, (batch, state_dim), jnp.float32)
    action = jax.random.normal(ka, (batch, action_dim), jnp.float32)

    out = critic_forward(state, action, slab,
                         hidden_size=hidden_size, output_size=output_size)
    out = jax.block_until_ready(out)
    ref = critic_reference(state, action, params)
    assert out.shape == (batch, output_size)
    assert jnp.allclose(out, ref, atol=1e-5, rtol=1e-5), (out, ref)

    # Also exercise the tiled path: grid > 1, ragged last block, no host pad.
    batch2 = 1037
    ks2, ka2 = jax.random.split(jax.random.PRNGKey(1))
    state2 = jax.random.normal(ks2, (batch2, state_dim), jnp.float32)
    action2 = jax.random.normal(ka2, (batch2, action_dim), jnp.float32)
    out2 = jax.block_until_ready(
        critic_forward(state2, action2, slab,
                       hidden_size=hidden_size, output_size=output_size))
    ref2 = critic_reference(state2, action2, params)
    assert out2.shape == (batch2, output_size)
    assert jnp.allclose(out2, ref2, atol=1e-5, rtol=1e-5)

    print("KERNEL_OK")
</pallas_src>

<mosaic_0001>
module attributes {stable_mosaic.version = 11 : i64} {
  func.func @kernel(%arg0: i32, %arg1: memref<2x6xf32, #tpu.memory_space<vmem>>, %arg2: memref<2x2xf32, #tpu.memory_space<vmem>>, %arg3: memref<176x128xf32, #tpu.memory_space<vmem>>, %arg4: memref<2x1xf32, #tpu.memory_space<vmem>>) attributes {dimension_semantics = [#tpu.dimension_semantics<parallel>], iteration_bounds = array<i64: 1>, scalar_prefetch = 0 : i64, scratch_operands = 0 : i64, tpu.core_type = #tpu.core_type<tc>, window_params = [{transform_indices = @transform_0, window_bounds = array<i64: 2, 6>}, {transform_indices = @transform_1, window_bounds = array<i64: 2, 2>}, {pipeline_mode = #tpu.pipeline_mode<synchronous>, transform_indices = @transform_2, window_bounds = array<i64: 176, 128>}, {transform_indices = @transform_3, window_bounds = array<i64: 2, 1>}]} {
    %c0 = arith.constant 0 : index
    %c0_0 = arith.constant 0 : index
    %0 = vector.load %arg1[%c0, %c0_0] : memref<2x6xf32, #tpu.memory_space<vmem>>, vector<2x6xf32>
    %c0_1 = arith.constant 0 : index
    %c0_2 = arith.constant 0 : index
    %1 = vector.load %arg2[%c0_1, %c0_2] : memref<2x2xf32, #tpu.memory_space<vmem>>, vector<2x2xf32>
    %c0_3 = arith.constant 0 : index
    %c0_4 = arith.constant 0 : index
    %2 = vector.load %arg3[%c0_3, %c0_4] : memref<176x128xf32, #tpu.memory_space<vmem>>, vector<6x128xf32>
    %c8 = arith.constant 8 : index
    %c0_5 = arith.constant 0 : index
    %3 = vector.load %arg3[%c8, %c0_5] : memref<176x128xf32, #tpu.memory_space<vmem>>, vector<2x128xf32>
    %c152 = arith.constant 152 : index
    %c0_6 = arith.constant 0 : index
    %4 = vector.load %arg3[%c152, %c0_6] : memref<176x128xf32, #tpu.memory_space<vmem>>, vector<1x128xf32>
    %cst = arith.constant dense<0.000000e+00> : vector<2x128xf32>
    %5 = tpu.matmul %0, %2, %cst {dimension_numbers = #tpu.dot_dimension_numbers<[1], [0], [0], [1], [0, 0, 1, 1], [], []>} : vector<2x6xf32>, vector<6x128xf32>, vector<2x128xf32> -> vector<2x128xf32>
    %cst_7 = arith.constant dense<0.000000e+00> : vector<2x128xf32>
    %6 = tpu.matmul %1, %3, %cst_7 {dimension_numbers = #tpu.dot_dimension_numbers<[1], [0], [0], [1], [0, 0, 1, 1], [], []>} : vector<2x2xf32>, vector<2x128xf32>, vector<2x128xf32> -> vector<2x128xf32>
    %7 = arith.addf %5, %6 : vector<2x128xf32>
    %8 = vector.broadcast %4 : vector<1x128xf32> to vector<2x128xf32>
    %9 = arith.addf %7, %8 : vector<2x128xf32>
    %cst_8 = arith.constant 0.000000e+00 : f32
    %10 = vector.broadcast %cst_8 : f32 to vector<2x128xf32>
    %11 = arith.maximumf %9, %10 : vector<2x128xf32>
    %c16 = arith.constant 16 : index
    %c0_9 = arith.constant 0 : index
    %12 = vector.load %arg3[%c16, %c0_9] : memref<176x128xf32, #tpu.memory_space<vmem>>, vector<128x128xf32>
    %c160 = arith.constant 160 : index
    %c0_10 = arith.constant 0 : index
    %13 = vector.load %arg3[%c160, %c0_10] : memref<176x128xf32, #tpu.memory_space<vmem>>, vector<1x128xf32>
    %cst_11 = arith.constant dense<0.000000e+00> : vector<2x128xf32>
    %14 = tpu.matmul %11, %12, %cst_11 {dimension_numbers = #tpu.dot_dimension_numbers<[1], [0], [0], [1], [0, 0, 1, 1], [], []>} : vector<2x128xf32>, vector<128x128xf32>, vector<2x128xf32> -> vector<2x128xf32>
    %15 = vector.broadcast %13 : vector<1x128xf32> to vector<2x128xf32>
    %16 = arith.addf %14, %15 : vector<2x128xf32>
    %cst_12 = arith.constant 0.000000e+00 : f32
    %17 = vector.broadcast %cst_12 : f32 to vector<2x128xf32>
    %18 = arith.maximumf %16, %17 : vector<2x128xf32>
    %c144 = arith.constant 144 : index
    %c0_13 = arith.constant 0 : index
    %19 = vector.load %arg3[%c144, %c0_13] : memref<176x128xf32, #tpu.memory_space<vmem>>, vector<1x128xf32>
    %c168 = arith.constant 168 : index
    %c0_14 = arith.constant 0 : index
    %20 = vector.load %arg3[%c168, %c0_14] : memref<176x128xf32, #tpu.memory_space<vmem>>, vector<1x1xf32>
    %21 = vector.broadcast %19 : vector<1x128xf32> to vector<2x128xf32>
    %22 = arith.mulf %18, %21 : vector<2x128xf32>
    %cst_15 = arith.constant dense<0.000000e+00> : vector<2xf32>
    %23 = vector.multi_reduction <add>, %22, %cst_15 [1] : vector<2x128xf32> to vector<2xf32>
    %24 = vector.shape_cast %23 : vector<2xf32> to vector<2x1xf32>
    %25 = vector.broadcast %20 : vector<1x1xf32> to vector<2x1xf32>
    %26 = arith.addf %24, %25 : vector<2x1xf32>
    %c0_16 = arith.constant 0 : index
    %c0_17 = arith.constant 0 : index
    %27 = vector.load %arg4[%c0_16, %c0_17] : memref<2x1xf32, #tpu.memory_space<vmem>>, vector<2x1xf32>
    tpu.vector_store %arg4[%c0_16, %c0_17], %26 {strides = array<i32>} : memref<2x1xf32, #tpu.memory_space<vmem>>, vector<2x1xf32>,
    return
  }
  func.func @transform_0(%arg0: i32) -> (i32, i32) {
    %c0_i32 = arith.constant 0 : i32
    %c0_i32_0 = arith.constant 0 : i32
    return %arg0, %c0_i32 : i32, i32
  }
  func.func @transform_1(%arg0: i32) -> (i32, i32) {
    %c0_i32 = arith.constant 0 : i32
    %c0_i32_0 = arith.constant 0 : i32
    return %arg0, %c0_i32 : i32, i32
  }
  func.func @transform_2(%arg0: i32) -> (i32, i32) {
    %c0_i32 = arith.constant 0 : i32
    %c0_i32_0 = arith.constant 0 : i32
    %c0_i32_1 = arith.constant 0 : i32
    return %c0_i32, %c0_i32_0 : i32, i32
  }
  func.func @transform_3(%arg0: i32) -> (i32, i32) {
    %c0_i32 = arith.constant 0 : i32
    %c0_i32_0 = arith.constant 0 : i32
    return %arg0, %c0_i32 : i32, i32
  }
}

</mosaic_0001>

<bundles_post_ra>
// kernel: tpu_custom_call.1
= control target key start
LH: loop header
LB: loop body
LE: loop exit
PB: predicated region body
PF: predicated region fallthrough
CT: control target
= control target key end

     0   :  { %8 = vsyncpa [#allocation3], 0  ;;  %s305_s0 = inlined_call_operand.hbm [shape: f32[2,6], index: 0, kind: input, shape index: {}]   ;;  %s306_s1 = inlined_call_operand.hbm [shape: f32[2,2], index: 1, kind: input, shape index: {}]   ;;  %s307_s2 = inlined_call_operand.hbm [shape: f32[176,128], index: 2, kind: input, shape index: {}]   ;;  %s308_s3 = inlined_call_operand.vmem [shape: f32[2,1], index: 3, kind: output, shape index: {}]  }
   0x1   :  { %9 = vsyncpa [#allocation5], 0  ;;  %s26_s14 = sshll.u32 %s306_s1, 4  ;;  %s266_s15 = smov [#allocation4]   ;;  %s27_s14 = int_to_ptr.hbm [resolvable:$true] %s26_s14 }
   0x2   :  { %s28_s16 = sshll.u32 %s266_s15, 4  ;;  %s15_s19 = sshll.u32 %s305_s0, 4  ;;  %s29_s16 = int_to_ptr.vmem [resolvable:$true] %s28_s16  ;;  %s16_s19 = int_to_ptr.hbm [resolvable:$true] %s15_s19 }
   0x3   :  { %31 = dma.hbm_to_vmem [thread:$0]  %s27_s14, 32, %s29_s16, [#allocation5]  }
   0x4   :  { %s267_s20 = smov [#allocation2]   ;;  %s36_s24 = sshll.u32 %s307_s2, 4  ;;  %s37_s24 = int_to_ptr.hbm [resolvable:$true] %s36_s24 }
   0x5   :  { %s17_s21 = sshll.u32 %s267_s20, 4  ;;  %s268_s1 = smov [#allocation6]   ;;  %s18_s21 = int_to_ptr.vmem [resolvable:$true] %s17_s21 }
   0x6   :  { %20 = dma.hbm_to_vmem [thread:$0]  %s16_s19, 32, %s18_s21, [#allocation3]  }
   0x7   :  { %s38_s25 = sshll.u32 %s268_s1, 4  ;;  %s269_s26 = smov 128   ;;  %s39_s25 = int_to_ptr.vmem [resolvable:$true] %s38_s25 }
   0x8   :  { %s270_s27 = smov 8  }
   0x9   :  { %44 = dma.hbm_to_vmem [thread:$0]  %s37_s24, 2816, %s39_s25, [#allocation5], %s269_s26, %s269_s26, %s270_s27  }
   0xa   :  { %262 = dma.done.wait [#allocation3], 32  }
   0xb   :  { %263 = vsyncadd [#allocation3], 4294967264 }
   0xc   :  { %264 = dma.done.wait [#allocation5], 2848  }
   0xd   :  { %265 = vsyncadd [#allocation5], 4294964448  ;;  %vm66_vm0 = vcmask 1041408   ;;  %vm94_vm1 = vcmask 1045504   ;;  %vm62_vm2 = vcmask 15360   ;;  %vm90_vm3 = vcmask 48128  }
   0xe   :  { %v60_v0 = vld [vmem:[#allocation6 + $0x8] sm:$0x3]  ;;  %v59_v1 = vld [vmem:[#allocation6] sm:$0x3f]  ;;  %v58_v2 = vld [vmem:[#allocation4] sm:$0x3] }
   0xf   :  { %177 = vmatpush.msk.msra.mxu0 %vm66_vm0, %v60_v0  ;;  %179 = vmatpush.msk.msra.mxu1 %vm94_vm1, %v59_v1  ;;  %v57_v3 = vld [vmem:[#allocation2] sm:$0x3]  ;;  %v136_v4 = vld [vmem:[#allocation6 + $0x88] sm:$0xff]  ;;  %v135_v5 = vld [vmem:[#allocation6 + $0x80] sm:$0xff]  ;;  %vm169_vm4 = vcmask 1024  }
  0x10   :  { %178 = vmatmul.msk.f32.vlgmr.msra.gmra.mxu0 %vm62_vm2, %v58_v2  ;;  %180 = vmatmul.msk.f32.vlgmr.msra.gmra.mxu1 %vm90_vm3, %v57_v3  ;;  %v134_v6 = vld [vmem:[#allocation6 + $0x78] sm:$0xff]  ;;  %v133_v7 = vld [vmem:[#allocation6 + $0x70] sm:$0xff]  ;;  %v132_v8 = vld [vmem:[#allocation6 + $0x68] sm:$0xff] }
  0x11   :  { %139 = vmatpush.msra.mxu2 %v136_v4  ;;  %v131_v9 = vld [vmem:[#allocation6 + $0x60] sm:$0xff]  ;;  %v130_v10 = vld [vmem:[#allocation6 + $0x58] sm:$0xff]  ;;  %v129_v11 = vld [vmem:[#allocation6 + $0x50] sm:$0xff] }
  0x12   :  { %v128_v12 = vld [vmem:[#allocation6 + $0x48] sm:$0xff]  ;;  %v127_v13 = vld [vmem:[#allocation6 + $0x40] sm:$0xff]  ;;  %v126_v14 = vld [vmem:[#allocation6 + $0x38] sm:$0xff] }
  0x13   :  { %140 = vmatpush.msra.mxu2 %v135_v5  ;;  %v125_v15 = vld [vmem:[#allocation6 + $0x30] sm:$0xff]  ;;  %v124_v16 = vld [vmem:[#allocation6 + $0x28] sm:$0xff]  ;;  %v123_v17 = vld [vmem:[#allocation6 + $0x20] sm:$0xff] }
  0x14   :  { %v122_v18 = vld [vmem:[#allocation6 + $0x18] sm:$0xff]  ;;  %v121_v19 = vld [vmem:[#allocation6 + $0x10] sm:$0xff]  ;;  %v187_v26 = vld [vmem:[#allocation6 + $0xa0] ss:$0 sm:$0xff] }
  0x15   :  { %141 = vmatpush.msra.mxu2 %v134_v6  ;;  %v186_v20 = vld [vmem:[#allocation6 + $0x98] ss:$0 sm:$0xff]  ;;  %v188_v29 = vld [vmem:[#allocation6 + $0x90] ss:$0 sm:$0xff]  ;;  %v189_v33 = vld [vmem:[#allocation6 + $0xa8] ss:$0 sm:$0xff] }
  0x17   :  { %142 = vmatpush.msra.mxu2 %v133_v7 }
  0x19   :  { %143 = vmatpush.msra.mxu2 %v132_v8 }
  0x1b   :  { %144 = vmatpush.msra.mxu2 %v131_v9 }
  0x1d   :  { %145 = vmatpush.msra.mxu2 %v130_v10 }
  0x1f   :  { %146 = vmatpush.msra.mxu2 %v129_v11 }
  0x21   :  { %147 = vmatpush.msra.mxu2 %v128_v12 }
  0x23   :  { %148 = vmatpush.msra.mxu2 %v127_v13 }
  0x25   :  { %149 = vmatpush.msra.mxu2 %v126_v14 }
  0x27   :  { %150 = vmatpush.msra.mxu2 %v125_v15 }
  0x29   :  { %151 = vmatpush.msra.mxu2 %v124_v16 }
  0x2b   :  { %152 = vmatpush.msra.mxu2 %v123_v17 }
  0x2d   :  { %153 = vmatpush.msra.mxu2 %v122_v18 }
  0x2f   :  { %154 = vmatpush.msra.mxu2 %v121_v19 }
  0x8d   :  { %v87_v21 = vpop.f32.mrf.mxu0  ;;  %v115_v22 = vpop.f32.mrf.mxu1 }
  0x8e   :  { %v116_v23 = vadd.f32 %v115_v22, %v87_v21 }
  0x90   :  { %v119_v24 = vadd.f32 %v186_v20, %v116_v23 }
  0x92   :  { %v120_v25 = vmax.f32 %v119_v24, 0.0 }
  0x94   :  { %155 = vmatmul.f32.vlgmr.msra.gmra.mxu2 %v120_v25 }
 0x117   :  { %v156_v27 = vpop.f32.mrf.mxu2 }
 0x118   :  { %v157_v28 = vadd.f32 %v187_v26, %v156_v27 }
 0x11a   :  { %v159_v30 = vmax.f32 %v157_v28, 0.0 }
 0x11c   :  { %v163_v31 = vmul.f32 %v188_v29, %v159_v30 }
 0x11e   :  { %v164_v32 = vsel %vm66_vm0, %v163_v31, 0.0 }
 0x11f   :  { %165 = vadd.xlane.f32.xlu0 %v164_v32 }
 0x192   :  { %v166_v34 = vpop.xlane.xlu0 %165 }
 0x193   :  { %v168_v35 = vadd.f32 %v189_v33, %v166_v34 }
 0x195   :  { %170 = vst.msk [vmem:[%s308_s3] sm:$0x3] %vm169_vm4, %v168_v35 }
 0x196   :  { %175 = vsyncpa [#allocation3], 1 }
 0x197   :  { %176 = vsyncpa [#allocation5], 1 }

</bundles_post_ra>
